<compile_context>
chip_gen: v7x
topology: tpu7x:2x2x1
jax: 0.10.0
libtpu: 0.0.40
codegen_flags: <defaults>
</compile_context>

<pallas_src>
import jax
import jax.numpy as jnp
from jax.experimental import pallas as pl
from jax.experimental.pallas import tpu as pltpu


# ---------------------------------------------------------------------------
# Kernels
# ---------------------------------------------------------------------------
def _upsampling_kernel_nhwc(x_ref, w0_ref, w1_ref, shift_ref, o_ref):
    """Two (block_m, Cin) @ (Cin, 2*Cout) MXU matmuls (kh=0 / kh=1 weight halves)
    with f32 accumulation, BN shift + ReLU on the VPU, stored so the output block
    is already un-cropped NHWC:  o[(n,i), kh, j, (kw,co)]."""
    br, _, w, c2 = o_ref.shape              # (block_rows, 2, W, 2*Cout)
    x = x_ref[...]                           # (block_rows * W, Cin)
    s = shift_ref[...]                       # (1, 2*Cout) f32
    y0 = jnp.maximum(
        jnp.dot(x, w0_ref[...], preferred_element_type=jnp.float32) + s, 0.0)
    y1 = jnp.maximum(
        jnp.dot(x, w1_ref[...], preferred_element_type=jnp.float32) + s, 0.0)
    # (br*W, 2*Cout) -> (br, W, 2*Cout): lane dim unchanged, sublane split on a
    # W-row boundary (this path requires W % 8 == 0), so it is a layout no-op.
    o_ref[:, 0, :, :] = y0.reshape(br, w, c2).astype(o_ref.dtype)
    o_ref[:, 1, :, :] = y1.reshape(br, w, c2).astype(o_ref.dtype)


def _upsampling_kernel_flat(x_ref, w_ref, shift_ref, o_ref):
    """Fallback (only when W % 8 != 0): output columns ordered (kh, kw, co); the
    2x2 interleave is then done by one XLA permutation after the kernel."""
    y = jnp.dot(x_ref[...], w_ref[...], preferred_element_type=jnp.float32)
    o_ref[...] = jnp.maximum(y + shift_ref[...], 0.0).astype(o_ref.dtype)


# ---------------------------------------------------------------------------
# Sizing helpers
# ---------------------------------------------------------------------------
def _round_up(v, m):
    return (v + m - 1) // m * m


def _sublanes(dtype):
    return max(8, 32 // jnp.dtype(dtype).itemsize)   # f32 -> 8, bf16 -> 16


def _tile_bytes(shape, dtype):
    """VMEM footprint of one block with (sublane, lane) padding on the last 2 dims."""
    dims = list(shape)
    dims[-1] = _round_up(dims[-1], 128)
    if len(dims) >= 2:
        dims[-2] = _round_up(dims[-2], _sublanes(dtype))
    n = 1
    for d in dims:
        n *= d
    return n * jnp.dtype(dtype).itemsize


def _tpu_hw_params():
    """(per-core VMEM bytes, TensorCores sharing a parallel grid axis)."""
    vmem_bytes = 64 * 1024 * 1024      # conservative default == v7x per-TC VMEM
    num_cores = 2                      # even-step preference is harmless on 1-TC chips
    try:
        info = pltpu.get_tpu_info()
        vmem_bytes = int(getattr(info, "vmem_capacity_bytes", vmem_bytes))
        for attr in ("num_cores", "core_count", "num_tensorcores",
                     "tensorcores_per_chip"):
            v = getattr(info, attr, None)
            if isinstance(v, int) and v > 0:
                num_cores = v
                break
    except Exception:
        pass
    return vmem_bytes, num_cores


def _pick_block_rows(R, W, bytes_per_pixel, budget_bytes, num_cores):
    """Block = `br` whole input image rows (br * W pixels per grid step).

    Preference: (a) >=512-pixel tiles AND a step count that is a multiple of
    num_cores and >= 2*num_cores (keeps both v7x TCs busy, hides tail skew),
    then (b) balanced & >= 2*num_cores steps, (c) balanced, (d) any divisor.
    br = 1 always divides R, so awkward N*H never collapses the tile below one
    image row (and never forces a full-extent block).
    """
    cap = max(1, min(R, budget_bytes // max(1, 2 * W * bytes_per_pixel)))
    divs = [d for d in range(1, R + 1) if R % d == 0 and d <= cap]
    preds = (
        lambda d: d * W >= 512 and (R // d) % num_cores == 0 and R // d >= 2 * num_cores,
        lambda d: (R // d) % num_cores == 0 and R // d >= 2 * num_cores,
        lambda d: (R // d) % num_cores == 0,
        lambda d: True,
    )
    for pred in preds:
        cands = [d for d in divs if pred(d)]
        if cands:
            return max(cands)
    return 1


# ---------------------------------------------------------------------------
# Forward wrapper
# ---------------------------------------------------------------------------
def upsampling_forward(x_nchw, weight, gamma, beta, running_mean, running_var,
                       eps=1e-5, block_rows=None, compute_dtype=jnp.bfloat16,
                       out_dtype=None, output_layout="NCHW"):
    """Eval-mode UpSampling forward.

    x_nchw: (N, Cin, H, W); weight: ConvTranspose2d (Cin, Cout, 2, 2).
    Returns (N, Cout, 2H-1, 2W-1) NCHW (or NHWC if output_layout="NHWC", which
    drops the final transpose pass entirely).
    """
    N, Cin, H, W = x_nchw.shape
    Cout = weight.shape[1]
    R = N * H                         # input image rows
    M = R * W                         # input pixels
    out_dtype = x_nchw.dtype if out_dtype is None else jnp.dtype(out_dtype)

    # ---- fold BatchNorm (eval) into the conv weight; keep the shift in f32 ----
    scale = gamma / jnp.sqrt(running_var + eps)                  # (Cout,)
    shift = beta - running_mean * scale                          # (Cout,)
    # (Cin, Cout, kh, kw) -> w_kh[kh] = (Cin, [kw, co]): output column order is
    # already the NHWC minor order (kw, co).
    w_kh = jnp.transpose(weight, (2, 0, 3, 1)).reshape(2, Cin, 2 * Cout)
    scale2 = jnp.tile(scale, 2)[None, :]
    w0 = (w_kh[0] * scale2).astype(compute_dtype)
    w1 = (w_kh[1] * scale2).astype(compute_dtype)
    shift2 = jnp.tile(shift, 2).reshape(1, 2 * Cout).astype(jnp.float32)

    # ---- XLA glue: NCHW -> (M, Cin) channels-last rows, bf16 streaming dtype ----
    # TODO(synk): accept NHWC input directly if the surrounding model allows it;
    # that removes this full input HBM pass.
    x_flat = jnp.transpose(x_nchw, (0, 2, 3, 1)).reshape(M, Cin).astype(compute_dtype)

    # ---- hardware-aware tile sizing / VMEM accounting ----
    vmem_cap, num_cores = _tpu_hw_params()
    small_vmem = vmem_cap < 100 * 1024 * 1024          # v7x: 64 MiB per TC
    tile_budget = (10 if small_vmem else 24) * 1024 * 1024
    vmem_cap_limit = (40 if small_vmem else 80) * 1024 * 1024
    in_b = jnp.dtype(compute_dtype).itemsize
    out_b = jnp.dtype(out_dtype).itemsize
    bytes_per_pixel = Cin * in_b + 4 * Cout * out_b
    if block_rows is None:
        block_rows = _pick_block_rows(R, W, bytes_per_pixel, tile_budget, num_cores)
    br = int(block_rows)
    assert R % br == 0, (R, br)
    block_m = br * W

    if W % 8 == 0:
        # padded-tile VMEM estimate, everything double-buffered (incl. weights)
        need = 2 * (_tile_bytes((block_m, Cin), compute_dtype)
                    + _tile_bytes((br, 2, W, 2 * Cout), out_dtype)
                    + 2 * _tile_bytes((Cin, 2 * Cout), compute_dtype)
                    + _tile_bytes((1, 2 * Cout), jnp.float32))
        vmem_limit = int(min(vmem_cap_limit,
                             max(16 * 1024 * 1024, need + need // 2)))

        out4 = pl.pallas_call(
            _upsampling_kernel_nhwc,
            out_shape=jax.ShapeDtypeStruct((R, 2, W, 2 * Cout), out_dtype),
            grid_spec=pltpu.PrefetchScalarGridSpec(
                num_scalar_prefetch=0,
                grid=(R // br,),
                in_specs=[
                    pl.BlockSpec((block_m, Cin), lambda r: (r, 0)),
                    pl.BlockSpec((Cin, 2 * Cout), lambda r: (0, 0)),
                    pl.BlockSpec((Cin, 2 * Cout), lambda r: (0, 0)),
                    pl.BlockSpec((1, 2 * Cout), lambda r: (0, 0)),
                ],
                out_specs=pl.BlockSpec((br, 2, W, 2 * Cout),
                                       lambda r: (r, 0, 0, 0)),
            ),
            compiler_params=pltpu.CompilerParams(
                dimension_semantics=("parallel",),
                vmem_limit_bytes=vmem_limit),
        )(x_flat, w0, w1, shift2)

        # (R, 2, W, 2*Cout) memory order is (n, i, kh, j, kw, co) == un-cropped
        # NHWC, so this reshape is free.  Only the crop (+ optional standard
        # NHWC->NCHW transpose) touches HBM after the kernel.
        y = out4.reshape(N, 2 * H, 2 * W, Cout)[:, 1:, 1:, :]
        if output_layout == "NHWC":
            return y
        return jnp.transpose(y, (0, 3, 1, 2))

    # ---- fallback for W not a multiple of 8 (never hit by typical FCN shapes):
    # flat (M, 4*Cout) output, interleave + crop done by one XLA permutation ----
    cap_px = max(8, tile_budget // max(1, 2 * bytes_per_pixel))
    bm = None
    for b in range(8, min(cap_px, M) + 1, 8):
        if M % b == 0:
            bm = b
    block_m_fb = bm if bm is not None else M
    need_fb = 2 * (_tile_bytes((block_m_fb, Cin), compute_dtype)
                   + _tile_bytes((block_m_fb, 4 * Cout), out_dtype)
                   + _tile_bytes((Cin, 4 * Cout), compute_dtype)
                   + _tile_bytes((1, 4 * Cout), jnp.float32))
    vmem_limit_fb = int(min(vmem_cap_limit,
                            max(16 * 1024 * 1024, need_fb + need_fb // 2)))
    w_flat = jnp.concatenate([w0, w1], axis=1)            # columns (kh, kw, co)
    shift4 = jnp.concatenate([shift2, shift2], axis=1)
    out_flat = pl.pallas_call(
        _upsampling_kernel_flat,
        out_shape=jax.ShapeDtypeStruct((M, 4 * Cout), out_dtype),
        grid_spec=pltpu.PrefetchScalarGridSpec(
            num_scalar_prefetch=0,
            grid=(M // block_m_fb,),
            in_specs=[
                pl.BlockSpec((block_m_fb, Cin), lambda r: (r, 0)),
                pl.BlockSpec((Cin, 4 * Cout), lambda r: (0, 0)),
                pl.BlockSpec((1, 4 * Cout), lambda r: (0, 0)),
            ],
            out_specs=pl.BlockSpec((block_m_fb, 4 * Cout), lambda r: (r, 0)),
        ),
        compiler_params=pltpu.CompilerParams(
            dimension_semantics=("parallel",),
            vmem_limit_bytes=vmem_limit_fb),
    )(x_flat, w_flat, shift4)
    y6 = out_flat.reshape(N, H, W, 2, 2, Cout)
    if output_layout == "NHWC":
        y = jnp.transpose(y6, (0, 1, 3, 2, 4, 5)).reshape(N, 2 * H, 2 * W, Cout)
        return y[:, 1:, 1:, :]
    y = jnp.transpose(y6, (0, 5, 1, 3, 2, 4)).reshape(N, Cout, 2 * H, 2 * W)
    return y[:, :, 1:, 1:]


# ---------------------------------------------------------------------------
# Pure-JAX reference (f32, highest precision)
# ---------------------------------------------------------------------------
def _reference(x_nchw, weight, gamma, beta, rm, rv, eps=1e-5):
    N, Cin, H, W = x_nchw.shape
    Cout = weight.shape[1]
    # out_full[n, 2i+kh, 2j+kw, co] = sum_ci x[n,ci,i,j] * W[ci,co,kh,kw]
    y = jnp.einsum('ncij,cokl->nikjlo', x_nchw, weight, precision='highest')
    y = y.reshape(N, 2 * H, 2 * W, Cout)[:, 1:, 1:, :]
    scale = gamma / jnp.sqrt(rv + eps)
    shift = beta - rm * scale
    y = jnp.maximum(y * scale + shift, 0.0)
    return jnp.transpose(y, (0, 3, 1, 2))


if __name__ == "__main__":
    key = jax.random.PRNGKey(0)
    kx, kw = jax.random.split(key)

    N, in_ch, out_ch, H, W = 2, 4, 8, 16, 16

    x = jax.random.normal(kx, (N, in_ch, H, W), dtype=jnp.float32)

    # ConvTranspose2d weight (in_ch, out_ch, 2, 2), kaiming_normal_:
    # fan_in = out_ch * 2 * 2 -> std = sqrt(2 / fan_in)
    std = (2.0 / (out_ch * 2 * 2)) ** 0.5
    weight = std * jax.random.normal(kw, (in_ch, out_ch, 2, 2), dtype=jnp.float32)

    # BatchNorm params per _init_weight: weight=1, bias=0; default running stats.
    gamma = jnp.ones((out_ch,), jnp.float32)
    beta = jnp.zeros((out_ch,), jnp.float32)
    running_mean = jnp.zeros((out_ch,), jnp.float32)
    running_var = jnp.ones((out_ch,), jnp.float32)

    ref = _reference(x, weight, gamma, beta, running_mean, running_var)

    # Default path: output dtype matches the input (module-faithful f32).
    out = jax.jit(upsampling_forward)(x, weight, gamma, beta,
                                      running_mean, running_var)
    out = jax.block_until_ready(out)
    assert out.shape == (N, out_ch, 2 * H - 1, 2 * W - 1), out.shape
    max_err = float(jnp.max(jnp.abs(out - ref)))
    # Tolerance covers bf16 quantization of the streaming operands
    # (f32 MXU accumulation keeps the rest exact).
    assert jnp.allclose(out, ref, rtol=3e-2, atol=3e-2), max_err

    # bf16-output variant (perf-review item: halves the dominant output stream).
    out_bf16 = jax.jit(lambda *a: upsampling_forward(*a, out_dtype=jnp.bfloat16))(
        x, weight, gamma, beta, running_mean, running_var)
    out_bf16 = jax.block_until_ready(out_bf16)
    max_err_bf16 = float(jnp.max(jnp.abs(out_bf16.astype(jnp.float32) - ref)))
    assert jnp.allclose(out_bf16.astype(jnp.float32), ref,
                        rtol=6e-2, atol=6e-2), max_err_bf16

    print("KERNEL_OK")
</pallas_src>

<mosaic_0001>
module attributes {stable_mosaic.version = 11 : i64} {
  func.func @_upsampling_kernel_nhwc(%arg0: i32, %arg1: memref<128x4xbf16, #tpu.memory_space<vmem>>, %arg2: memref<4x16xbf16, #tpu.memory_space<vmem>>, %arg3: memref<4x16xbf16, #tpu.memory_space<vmem>>, %arg4: memref<1x16xf32, #tpu.memory_space<vmem>>, %arg5: memref<8x2x16x16xf32, #tpu.memory_space<vmem>>) attributes {dimension_semantics = [#tpu.dimension_semantics<parallel>], iteration_bounds = array<i64: 4>, scalar_prefetch = 0 : i64, scratch_operands = 0 : i64, tpu.core_type = #tpu.core_type<tc>, window_params = [{transform_indices = @transform_0, window_bounds = array<i64: 128, 4>}, {pipeline_mode = #tpu.pipeline_mode<synchronous>, transform_indices = @transform_1, window_bounds = array<i64: 4, 16>}, {pipeline_mode = #tpu.pipeline_mode<synchronous>, transform_indices = @transform_2, window_bounds = array<i64: 4, 16>}, {pipeline_mode = #tpu.pipeline_mode<synchronous>, transform_indices = @transform_3, window_bounds = array<i64: 1, 16>}, {transform_indices = @transform_4, window_bounds = array<i64: 8, 2, 16, 16>}]} {
    %c0 = arith.constant 0 : index
    %c0_0 = arith.constant 0 : index
    %0 = vector.load %arg1[%c0, %c0_0] : memref<128x4xbf16, #tpu.memory_space<vmem>>, vector<128x4xbf16>
    %c0_1 = arith.constant 0 : index
    %c0_2 = arith.constant 0 : index
    %1 = vector.load %arg4[%c0_1, %c0_2] : memref<1x16xf32, #tpu.memory_space<vmem>>, vector<1x16xf32>
    %c0_3 = arith.constant 0 : index
    %c0_4 = arith.constant 0 : index
    %2 = vector.load %arg2[%c0_3, %c0_4] : memref<4x16xbf16, #tpu.memory_space<vmem>>, vector<4x16xbf16>
    %cst = arith.constant dense<0.000000e+00> : vector<128x16xf32>
    %3 = tpu.matmul %0, %2, %cst {dimension_numbers = #tpu.dot_dimension_numbers<[1], [0], [0], [1], [0, 0, 1, 1], [], []>} : vector<128x4xbf16>, vector<4x16xbf16>, vector<128x16xf32> -> vector<128x16xf32>
    %4 = vector.broadcast %1 : vector<1x16xf32> to vector<128x16xf32>
    %5 = arith.addf %3, %4 : vector<128x16xf32>
    %cst_5 = arith.constant 0.000000e+00 : f32
    %6 = vector.broadcast %cst_5 : f32 to vector<128x16xf32>
    %7 = arith.maximumf %5, %6 : vector<128x16xf32>
    %c0_6 = arith.constant 0 : index
    %c0_7 = arith.constant 0 : index
    %8 = vector.load %arg3[%c0_6, %c0_7] : memref<4x16xbf16, #tpu.memory_space<vmem>>, vector<4x16xbf16>
    %cst_8 = arith.constant dense<0.000000e+00> : vector<128x16xf32>
    %9 = tpu.matmul %0, %8, %cst_8 {dimension_numbers = #tpu.dot_dimension_numbers<[1], [0], [0], [1], [0, 0, 1, 1], [], []>} : vector<128x4xbf16>, vector<4x16xbf16>, vector<128x16xf32> -> vector<128x16xf32>
    %10 = vector.broadcast %1 : vector<1x16xf32> to vector<128x16xf32>
    %11 = arith.addf %9, %10 : vector<128x16xf32>
    %cst_9 = arith.constant 0.000000e+00 : f32
    %12 = vector.broadcast %cst_9 : f32 to vector<128x16xf32>
    %13 = arith.maximumf %11, %12 : vector<128x16xf32>
    %14 = vector.shape_cast %7 : vector<128x16xf32> to vector<8x16x16xf32>
    %c0_10 = arith.constant 0 : index
    %c0_11 = arith.constant 0 : index
    %c0_12 = arith.constant 0 : index
    %c0_13 = arith.constant 0 : index
    %15 = vector.load %arg5[%c0_10, %c0_11, %c0_12, %c0_13] : memref<8x2x16x16xf32, #tpu.memory_space<vmem>>, vector<8x1x16x16xf32>
    %16 = vector.shape_cast %15 : vector<8x1x16x16xf32> to vector<8x16x16xf32>
    %17 = vector.shape_cast %14 : vector<8x16x16xf32> to vector<8x1x16x16xf32>
    tpu.vector_store %arg5[%c0_10, %c0_11, %c0_12, %c0_13], %17 {strides = array<i32>} : memref<8x2x16x16xf32, #tpu.memory_space<vmem>>, vector<8x1x16x16xf32>,
    %18 = vector.shape_cast %13 : vector<128x16xf32> to vector<8x16x16xf32>
    %c0_14 = arith.constant 0 : index
    %c1 = arith.constant 1 : index
    %c0_15 = arith.constant 0 : index
    %c0_16 = arith.constant 0 : index
    %19 = vector.load %arg5[%c0_14, %c1, %c0_15, %c0_16] : memref<8x2x16x16xf32, #tpu.memory_space<vmem>>, vector<8x1x16x16xf32>
    %20 = vector.shape_cast %19 : vector<8x1x16x16xf32> to vector<8x16x16xf32>
    %21 = vector.shape_cast %18 : vector<8x16x16xf32> to vector<8x1x16x16xf32>
    tpu.vector_store %arg5[%c0_14, %c1, %c0_15, %c0_16], %21 {strides = array<i32>} : memref<8x2x16x16xf32, #tpu.memory_space<vmem>>, vector<8x1x16x16xf32>,
    return
  }
  func.func @transform_0(%arg0: i32) -> (i32, i32) {
    %c0_i32 = arith.constant 0 : i32
    %c0_i32_0 = arith.constant 0 : i32
    return %arg0, %c0_i32 : i32, i32
  }
  func.func @transform_1(%arg0: i32) -> (i32, i32) {
    %c0_i32 = arith.constant 0 : i32
    %c0_i32_0 = arith.constant 0 : i32
    %c0_i32_1 = arith.constant 0 : i32
    return %c0_i32, %c0_i32_0 : i32, i32
  }
  func.func @transform_2(%arg0: i32) -> (i32, i32) {
    %c0_i32 = arith.constant 0 : i32
    %c0_i32_0 = arith.constant 0 : i32
    %c0_i32_1 = arith.constant 0 : i32
    return %c0_i32, %c0_i32_0 : i32, i32
  }
  func.func @transform_3(%arg0: i32) -> (i32, i32) {
    %c0_i32 = arith.constant 0 : i32
    %c0_i32_0 = arith.constant 0 : i32
    %c0_i32_1 = arith.constant 0 : i32
    return %c0_i32, %c0_i32_0 : i32, i32
  }
  func.func @transform_4(%arg0: i32) -> (i32, i32, i32, i32) {
    %c0_i32 = arith.constant 0 : i32
    %c0_i32_0 = arith.constant 0 : i32
    %c0_i32_1 = arith.constant 0 : i32
    %c0_i32_2 = arith.constant 0 : i32
    return %arg0, %c0_i32, %c0_i32_0, %c0_i32_1 : i32, i32, i32, i32
  }
}

</mosaic_0001>

<bundles_post_ra>
// kernel: tile.18
= control target key start
LH: loop header
LB: loop body
LE: loop exit
PB: predicated region body
PF: predicated region fallthrough
CT: control target
= control target key end

     0   :  { %s22_s0 = inlined_call_operand.vmem [shape: f32[8], index: 0, kind: input, shape index: {}]   ;;  %s23_s1 = inlined_call_operand.vmem [shape: f32[2,8], index: 1, kind: output, shape index: {}]  }
   0x1   :  { %v4_v0 = vld [vmem:[%s22_s0] ss:$0 sm:$0xff] }
   0x2   :  { %5 = vst [vmem:[%s23_s1] sm:$0x3] %v4_v0 }

// kernel: tile.19
= control target key start
LH: loop header
LB: loop body
LE: loop exit
PB: predicated region body
PF: predicated region fallthrough
CT: control target
= control target key end

     0   :  { %vm7_vm0 = vcmask 64512   ;;  %vm13_vm1 = vcmask 130112   ;;  %s39_s0 = inlined_call_operand.vmem [shape: f32[2,8], index: 0, kind: input, shape index: {}]   ;;  %s40_s1 = inlined_call_operand.vmem [shape: f32[1,16], index: 1, kind: output, shape index: {}]  }
   0x1   :  { %v4_v0 = vld [vmem:[%s39_s0] sm:$0x3]  ;;  %s22_s0 = smov 8  }
   0x2   :  { %5 = vst [vmem:[#allocation1] sm:$0x3] %v4_v0 }
   0x9   :  { %v10_v1 = vld [vmem:[#allocation1 + $0x1] sm:$0x1]   ;;  %v6_v2 = vld [vmem:[#allocation1] sm:$0x1]  }
   0xa   :  { %11 = vrot.lane.b32.xlu0 %v10_v1, %s22_s0  ;;  %8 = vst.msk [vmem:[#allocation0] sm:$0x1] %vm7_vm0, %v6_v2  }
  0x7c   :  { %v12_v3 = vpop.permute.xlu0 %11  }
  0x7d   :  { %14 = vst.msk [vmem:[#allocation0] sm:$0x1] %vm13_vm1, %v12_v3  }
  0x84   :  { %v18_v4 = vld [vmem:[#allocation0] sm:$0x1] }
  0x85   :  { %20 = vst [vmem:[%s40_s1] sm:$0x1] %v18_v4 }

// kernel: mul.11
= control target key start
LH: loop header
LB: loop body
LE: loop exit
PB: predicated region body
PF: predicated region fallthrough
CT: control target
= control target key end

     0   :  { %vm7_vm0 = vcmask 64512   ;;  %vm13_vm1 = vcmask 130112   ;;  %s39_s0 = inlined_call_operand.vmem [shape: f32[2,8], index: 0, kind: input, shape index: {}]   ;;  %s40_s1 = inlined_call_operand.vmem [shape: f32[16], index: 1, kind: output, shape index: {}]  }
   0x1   :  { %v4_v0 = vld [vmem:[%s39_s0] sm:$0x3]  ;;  %s22_s0 = smov 8  }
   0x2   :  { %5 = vst [vmem:[#allocation1] sm:$0x3] %v4_v0 }
   0x9   :  { %v10_v1 = vld [vmem:[#allocation1 + $0x1] sm:$0x1]   ;;  %v6_v2 = vld [vmem:[#allocation1] sm:$0x1]  }
   0xa   :  { %11 = vrot.lane.b32.xlu0 %v10_v1, %s22_s0  ;;  %8 = vst.msk [vmem:[#allocation0] sm:$0x1] %vm7_vm0, %v6_v2  }
  0x7c   :  { %v12_v3 = vpop.permute.xlu0 %11  }
  0x7d   :  { %14 = vst.msk [vmem:[#allocation0] sm:$0x1] %vm13_vm1, %v12_v3  }
  0x84   :  { %v18_v4 = vld [vmem:[#allocation0] sm:$0x1] }
  0x85   :  { %20 = vst [vmem:[%s40_s1] sm:$0x1] %v18_v4 }

// kernel: squeeze.2
= control target key start
LH: loop header
LB: loop body
LE: loop exit
PB: predicated region body
PF: predicated region fallthrough
CT: control target
= control target key end

     0   :  { %vm21_vm0 = vcmask 64512   ;;  %vm27_vm1 = vcmask 130112   ;;  %s67_s0 = inlined_call_operand.vmem [shape: f32[1,4,2,8], index: 0, kind: input, shape index: {}]   ;;  %s68_s1 = inlined_call_operand.vmem [shape: f32[4,16], index: 1, kind: output, shape index: {}]  }
   0x1   :  { %v37_v0 = vld [vmem:[%s67_s0 + $0x6] sm:$0x3]  ;;  %v38_v1 = vld [vmem:[%s67_s0 + $0x4] sm:$0x3]  ;;  %v39_v2 = vld [vmem:[%s67_s0 + $0x2] sm:$0x3] }
   0x2   :  { %8 = vst [vmem:[#allocation1 + $0x18] sm:$0x3] %v37_v0  ;;  %13 = vst [vmem:[#allocation1 + $0x10] sm:$0x3] %v38_v1  ;;  %v18_v3 = vld [vmem:[%s67_s0] sm:$0x3] }
   0x3   :  { %17 = vst [vmem:[#allocation1 + $0x8] sm:$0x3] %v39_v2  ;;  %19 = vst [vmem:[#allocation1] sm:$0x3] %v18_v3  ;;  %s41_s0 = smov 8  }
   0xa   :  { %v24_v4 = vld [vmem:[#allocation1 + $0x1] ss:$8 sm:$0xf]   ;;  %v20_v5 = vld [vmem:[#allocation1] ss:$8 sm:$0xf]  }
   0xb   :  { %25 = vrot.lane.b32.xlu0 %v24_v4, %s41_s0  ;;  %22 = vst.msk [vmem:[#allocation0] sm:$0xf] %vm21_vm0, %v20_v5  }
  0x7d   :  { %v26_v6 = vpop.permute.xlu0 %25  }
  0x7e   :  { %28 = vst.msk [vmem:[#allocation0] sm:$0xf] %vm27_vm1, %v26_v6  }
  0x85   :  { %v32_v7 = vld [vmem:[#allocation0] sm:$0xf] }
  0x86   :  { %34 = vst [vmem:[%s68_s1] sm:$0xf] %v32_v7 }

// kernel: upsampling_forward.1
= control target key start
LH: loop header
LB: loop body
LE: loop exit
PB: predicated region body
PF: predicated region fallthrough
CT: control target
= control target key end

     0   :  { %s778_s15 = smov 0   ;;  %s924_s0 = inlined_call_operand.vmem [shape: bf16[512,4], index: 0, kind: input, shape index: {}]   ;;  %s925_s1 = inlined_call_operand.vmem [shape: bf16[4,16], index: 1, kind: input, shape index: {}]   ;;  %s926_s2 = inlined_call_operand.vmem [shape: bf16[4,16], index: 2, kind: input, shape index: {}]   ;;  %s927_s3 = inlined_call_operand.vmem [shape: f32[1,16], index: 3, kind: input, shape index: {}]   ;;  %s928_s4 = inlined_call_operand.vmem [shape: f32[32,2,16,16], index: 4, kind: output, shape index: {}]  }
   0x1 LB: > { %s619_s16 = sadd.s32 4294967295, %s751_s15   ;;  %p623_p0 = scmp.ge.s32.totalorder %s751_s15, 1  ;;  %s751_s15 = sphi %s778_s15, %s14_s15  }
   0x2   : > { %p163_p1 = scmp.lt.s32.totalorder %s751_s15, 5 }
   0x4   : > { %p164_p2 = pnand %p623_p0, %p163_p1 }
   0x5   : > { %v221_v0 = vld [vmem:[%s925_s1] sm:$0x3] (!%p164_p2)  ;;  %vm293_vm0 = vcmask (!%p164_p2), 1041408   ;;  %s624_s21 = sshll.u32 (!%p164_p2), %s619_s16, 4  ;;  %vm268_vm1 = vcmask (!%p164_p2), 31744   ;;  %s626_s26 = sshll.u32 (!%p164_p2), %s619_s16, 3 }
   0x6   : > { %167 = sbr.rel (%p164_p2) target bundleno = 262 (0x106), region = 36  ;;  %v410_v1 = vld [vmem:[%s926_s2] sm:$0x3] (!%p164_p2)  ;;  %727 = vmatprep.subr.msk.bf16.mxu0 (!%p164_p2), %vm293_vm0, %v221_v0  ;;  %v295_v2 = vsel (!%p164_p2), %vm293_vm0, %v221_v0, 0  ;;  %p191_p3 = scmp.lt.s32.totalorder (!%p164_p2), %s624_s21, 63  ;;  %vm527_vm2 = vcmask (!%p164_p2), 130048  }
   0x7   : > { %728 = vmatprep.subr.msk.bf16.mxu1 (!%p164_p2), %vm293_vm0, %v410_v1  ;;  %v412_v3 = vsel (!%p164_p2), %vm293_vm0, %v410_v1, 0  ;;  %692 = vmatpush3.bf16.msra.mxu0 (!%p164_p2), %v295_v2  ;;  %p197_p4 = scmp.lt.s32.totalorder (!%p164_p2), %s626_s26, 31  ;;  %v818_v12 = vld [vmem:[%s927_s3] ss:$0 sm:$0xff] (!%p164_p2) }
   0x8   : > { %710 = vmatpush3.bf16.msra.mxu1 (!%p164_p2), %v412_v3 }
   0xd   : > { %s930_s21 = smov (!%p191_p3, %s624_s21), 63  ;;  %s932_s26 = smov (!%p197_p4, %s626_s26), 31 }
   0xe   : > { %s625_s22 = sshll.u32 %s930_s21, 2  ;;  %s672_s29 = sshll.u32 %s932_s26, 5 }
   0xf   : > { %s194_s25 = scalar_lea.vmem %s924_s0, %s625_s22  ;;  %s825_s6 = scalar_lea.vmem %s928_s4, %s672_s29 }
  0x10   : > { %v737_v4 = vld [vmem:[%s194_s25] sm:$0xff]   ;;  %v738_v5 = vld [vmem:[%s194_s25 + $0x8] sm:$0xff]   ;;  %v739_v6 = vld [vmem:[%s194_s25 + $0x10] sm:$0xff]  }
  0x11   : > { %693 = vmatprep.mubr.msk.bf16.mxu0 %vm268_vm1, %v737_v4  ;;  %711 = vmatprep.mubr.msk.bf16.mxu1 %vm268_vm1, %v737_v4  ;;  %v740_v7 = vld [vmem:[%s194_s25 + $0x18] sm:$0xff]   ;;  %v741_v8 = vld [vmem:[%s194_s25 + $0x20] sm:$0xff]   ;;  %v742_v9 = vld [vmem:[%s194_s25 + $0x28] sm:$0xff]  }
  0x12   : > { %694 = vmatmul.mubr.msk.bf16.vlgmr.msra.gmra.mrb[0].mxu0 %vm268_vm1, %v738_v5  ;;  %712 = vmatmul.mubr.msk.bf16.vlgmr.msra.gmra.mrb[0].mxu1 %vm268_vm1, %v738_v5  ;;  %v743_v10 = vld [vmem:[%s194_s25 + $0x30] sm:$0xff]   ;;  %v744_v11 = vld [vmem:[%s194_s25 + $0x38] sm:$0xff]  }
  0x13   : > { %697 = vmatprep.mubr.msk.bf16.mxu0 %vm268_vm1, %v739_v6  ;;  %715 = vmatprep.mubr.msk.bf16.mxu1 %vm268_vm1, %v739_v6 }
  0x1a   : > { %698 = vmatmul.mubr.msk.bf16.gmra.mrb[4].mxu0 %vm268_vm1, %v740_v7  ;;  %716 = vmatmul.mubr.msk.bf16.gmra.mrb[4].mxu1 %vm268_vm1, %v740_v7 }
  0x1b   : > { %701 = vmatprep.mubr.msk.bf16.mxu0 %vm268_vm1, %v741_v8  ;;  %719 = vmatprep.mubr.msk.bf16.mxu1 %vm268_vm1, %v741_v8 }
  0x22   : > { %702 = vmatmul.mubr.msk.bf16.gmra.mrb[8].mxu0 %vm268_vm1, %v742_v9  ;;  %720 = vmatmul.mubr.msk.bf16.gmra.mrb[8].mxu1 %vm268_vm1, %v742_v9 }
  0x23   : > { %705 = vmatprep.mubr.msk.bf16.mxu0 %vm268_vm1, %v743_v10  ;;  %723 = vmatprep.mubr.msk.bf16.mxu1 %vm268_vm1, %v743_v10 }
  0x2a   : > { %706 = vmatmul.mubr.msk.bf16.gmra.mrb[12].mxu0 %vm268_vm1, %v744_v11  ;;  %724 = vmatmul.mubr.msk.bf16.gmra.mrb[12].mxu1 %vm268_vm1, %v744_v11 }
  0xe5   : > { %v695_v13 = vpop.f32.mrb[0].mxu0  ;;  %v713_v14 = vpop.f32.mrb[0].mxu1 }
  0xe6   : > { %v340_v15 = vadd.f32 %v695_v13, %v818_v12  ;;  %v457_v16 = vadd.f32 %v713_v14, %v818_v12  ;;  %v331_v17 = vpop.f32.mrb[1].mxu0  ;;  %v448_v18 = vpop.f32.mrb[1].mxu1 }
  0xe7   : > { %v332_v19 = vadd.f32 %v818_v12, %v331_v17  ;;  %v449_v20 = vadd.f32 %v818_v12, %v448_v18  ;;  %v696_v21 = vpop.f32.mrb[2].mxu0  ;;  %v714_v22 = vpop.f32.mrb[2].mxu1 }
  0xe8   : > { %v396_v23 = vmax.f32 %v340_v15, 0.0  ;;  %v513_v24 = vmax.f32 %v457_v16, 0.0  ;;  %v343_v25 = vadd.f32 %v696_v21, %v818_v12  ;;  %v460_v26 = vadd.f32 %v714_v22, %v818_v12  ;;  %v334_v27 = vpop.f32.mrb[3].mxu0  ;;  %v451_v28 = vpop.f32.mrb[3].mxu1 }
  0xe9   : > { %v394_v29 = vmax.f32 %v332_v19, 0.0  ;;  %v511_v30 = vmax.f32 %v449_v20, 0.0  ;;  %v335_v31 = vadd.f32 %v818_v12, %v334_v27  ;;  %v452_v32 = vadd.f32 %v818_v12, %v451_v28 }
  0xea   : > { %530 = vst.msk [vmem:[%s825_s6 + $0x20] sm:$0xff] %vm527_vm2, %v396_v23  ;;  %656 = vst.msk [vmem:[%s825_s6 + $0x30] sm:$0xff] %vm527_vm2, %v513_v24  ;;  %v397_v33 = vmax.f32 %v343_v25, 0.0  ;;  %v514_v34 = vmax.f32 %v460_v26, 0.0 }
  0xeb   : > { %528 = vst.msk [vmem:[%s825_s6] sm:$0xff] %vm527_vm2, %v394_v29  ;;  %654 = vst.msk [vmem:[%s825_s6 + $0x10] sm:$0xff] %vm527_vm2, %v511_v30  ;;  %v395_v35 = vmax.f32 %v335_v31, 0.0  ;;  %v512_v36 = vmax.f32 %v452_v32, 0.0 }
  0xec   : > { %531 = vst.msk [vmem:[%s825_s6 + $0x28] sm:$0xff] %vm527_vm2, %v397_v33  ;;  %657 = vst.msk [vmem:[%s825_s6 + $0x38] sm:$0xff] %vm527_vm2, %v514_v34 }
  0xed   : > { %529 = vst.msk [vmem:[%s825_s6 + $0x8] sm:$0xff] %vm527_vm2, %v395_v35  ;;  %655 = vst.msk [vmem:[%s825_s6 + $0x18] sm:$0xff] %vm527_vm2, %v512_v36  ;;  %v699_v37 = vpop.f32.mrb[4].mxu0  ;;  %v717_v38 = vpop.f32.mrb[4].mxu1 }
  0xee   : > { %v356_v39 = vadd.f32 %v699_v37, %v818_v12  ;;  %v473_v40 = vadd.f32 %v717_v38, %v818_v12  ;;  %v347_v41 = vpop.f32.mrb[5].mxu0  ;;  %v464_v42 = vpop.f32.mrb[5].mxu1 }
  0xef   : > { %v348_v43 = vadd.f32 %v818_v12, %v347_v41  ;;  %v465_v44 = vadd.f32 %v818_v12, %v464_v42  ;;  %v700_v45 = vpop.f32.mrb[6].mxu0  ;;  %v718_v46 = vpop.f32.mrb[6].mxu1 }
  0xf0   : > { %v400_v47 = vmax.f32 %v356_v39, 0.0  ;;  %v517_v48 = vmax.f32 %v473_v40, 0.0  ;;  %v359_v49 = vadd.f32 %v700_v45, %v818_v12  ;;  %v476_v50 = vadd.f32 %v718_v46, %v818_v12  ;;  %v350_v51 = vpop.f32.mrb[7].mxu0  ;;  %v467_v52 = vpop.f32.mrb[7].mxu1 }
  0xf1   : > { %v398_v53 = vmax.f32 %v348_v43, 0.0  ;;  %v515_v54 = vmax.f32 %v465_v44, 0.0  ;;  %v351_v55 = vadd.f32 %v818_v12, %v350_v51  ;;  %v468_v56 = vadd.f32 %v818_v12, %v467_v52 }
  0xf2   : > { %534 = vst.msk [vmem:[%s825_s6 + $0x60] sm:$0xff] %vm527_vm2, %v400_v47  ;;  %660 = vst.msk [vmem:[%s825_s6 + $0x70] sm:$0xff] %vm527_vm2, %v517_v48  ;;  %v401_v57 = vmax.f32 %v359_v49, 0.0  ;;  %v518_v58 = vmax.f32 %v476_v50, 0.0 }
  0xf3   : > { %532 = vst.msk [vmem:[%s825_s6 + $0x40] sm:$0xff] %vm527_vm2, %v398_v53  ;;  %658 = vst.msk [vmem:[%s825_s6 + $0x50] sm:$0xff] %vm527_vm2, %v515_v54  ;;  %v399_v59 = vmax.f32 %v351_v55, 0.0  ;;  %v516_v60 = vmax.f32 %v468_v56, 0.0 }
  0xf4   : > { %535 = vst.msk [vmem:[%s825_s6 + $0x68] sm:$0xff] %vm527_vm2, %v401_v57  ;;  %661 = vst.msk [vmem:[%s825_s6 + $0x78] sm:$0xff] %vm527_vm2, %v518_v58 }
  0xf5   : > { %533 = vst.msk [vmem:[%s825_s6 + $0x48] sm:$0xff] %vm527_vm2, %v399_v59  ;;  %659 = vst.msk [vmem:[%s825_s6 + $0x58] sm:$0xff] %vm527_vm2, %v516_v60  ;;  %v703_v61 = vpop.f32.mrb[8].mxu0  ;;  %v721_v62 = vpop.f32.mrb[8].mxu1 }
  0xf6   : > { %v372_v63 = vadd.f32 %v703_v61, %v818_v12  ;;  %v489_v0 = vadd.f32 %v721_v62, %v818_v12  ;;  %v363_v1 = vpop.f32.mrb[9].mxu0  ;;  %v480_v2 = vpop.f32.mrb[9].mxu1 }
  0xf7   : > { %v364_v3 = vadd.f32 %v818_v12, %v363_v1  ;;  %v481_v4 = vadd.f32 %v818_v12, %v480_v2  ;;  %v704_v5 = vpop.f32.mrb[10].mxu0  ;;  %v722_v6 = vpop.f32.mrb[10].mxu1 }
  0xf8   : > { %v404_v7 = vmax.f32 %v372_v63, 0.0  ;;  %v521_v8 = vmax.f32 %v489_v0, 0.0  ;;  %v375_v9 = vadd.f32 %v704_v5, %v818_v12  ;;  %v492_v10 = vadd.f32 %v722_v6, %v818_v12  ;;  %v366_v11 = vpop.f32.mrb[11].mxu0  ;;  %v483_v13 = vpop.f32.mrb[11].mxu1 }
  0xf9   : > { %v402_v14 = vmax.f32 %v364_v3, 0.0  ;;  %v519_v15 = vmax.f32 %v481_v4, 0.0  ;;  %v367_v16 = vadd.f32 %v818_v12, %v366_v11  ;;  %v484_v17 = vadd.f32 %v818_v12, %v483_v13 }
  0xfa   : > { %538 = vst.msk [vmem:[%s825_s6 + $0xa0] sm:$0xff] %vm527_vm2, %v404_v7  ;;  %664 = vst.msk [vmem:[%s825_s6 + $0xb0] sm:$0xff] %vm527_vm2, %v521_v8  ;;  %v405_v18 = vmax.f32 %v375_v9, 0.0  ;;  %v522_v19 = vmax.f32 %v492_v10, 0.0 }
  0xfb   : > { %536 = vst.msk [vmem:[%s825_s6 + $0x80] sm:$0xff] %vm527_vm2, %v402_v14  ;;  %662 = vst.msk [vmem:[%s825_s6 + $0x90] sm:$0xff] %vm527_vm2, %v519_v15  ;;  %v403_v20 = vmax.f32 %v367_v16, 0.0  ;;  %v520_v21 = vmax.f32 %v484_v17, 0.0 }
  0xfc   : > { %539 = vst.msk [vmem:[%s825_s6 + $0xa8] sm:$0xff] %vm527_vm2, %v405_v18  ;;  %665 = vst.msk [vmem:[%s825_s6 + $0xb8] sm:$0xff] %vm527_vm2, %v522_v19 }
  0xfd   : > { %537 = vst.msk [vmem:[%s825_s6 + $0x88] sm:$0xff] %vm527_vm2, %v403_v20  ;;  %663 = vst.msk [vmem:[%s825_s6 + $0x98] sm:$0xff] %vm527_vm2, %v520_v21  ;;  %v707_v22 = vpop.f32.mrb[12].mxu0  ;;  %v725_v23 = vpop.f32.mrb[12].mxu1 }
  0xfe   : > { %v388_v24 = vadd.f32 %v707_v22, %v818_v12  ;;  %v505_v25 = vadd.f32 %v725_v23, %v818_v12  ;;  %v379_v26 = vpop.f32.mrb[13].mxu0  ;;  %v496_v27 = vpop.f32.mrb[13].mxu1 }
  0xff   : > { %v380_v28 = vadd.f32 %v818_v12, %v379_v26  ;;  %v497_v29 = vadd.f32 %v818_v12, %v496_v27  ;;  %v708_v30 = vpop.f32.mrb[14].mxu0  ;;  %v726_v31 = vpop.f32.mrb[14].mxu1 }
 0x100   : > { %v408_v32 = vmax.f32 %v388_v24, 0.0  ;;  %v525_v33 = vmax.f32 %v505_v25, 0.0  ;;  %v391_v34 = vadd.f32 %v708_v30, %v818_v12  ;;  %v508_v35 = vadd.f32 %v726_v31, %v818_v12  ;;  %v382_v36 = vpop.f32.mrb[15].mxu0  ;;  %v499_v37 = vpop.f32.mrb[15].mxu1 }
 0x101   : > { %v406_v38 = vmax.f32 %v380_v28, 0.0  ;;  %v523_v39 = vmax.f32 %v497_v29, 0.0  ;;  %v383_v40 = vadd.f32 %v818_v12, %v382_v36  ;;  %v500_v41 = vadd.f32 %v818_v12, %v499_v37 }
 0x102   : > { %542 = vst.msk [vmem:[%s825_s6 + $0xe0] sm:$0xff] %vm527_vm2, %v408_v32  ;;  %668 = vst.msk [vmem:[%s825_s6 + $0xf0] sm:$0xff] %vm527_vm2, %v525_v33  ;;  %v409_v42 = vmax.f32 %v391_v34, 0.0  ;;  %v526_v43 = vmax.f32 %v508_v35, 0.0 }
 0x103   : > { %540 = vst.msk [vmem:[%s825_s6 + $0xc0] sm:$0xff] %vm527_vm2, %v406_v38  ;;  %666 = vst.msk [vmem:[%s825_s6 + $0xd0] sm:$0xff] %vm527_vm2, %v523_v39  ;;  %v407_v44 = vmax.f32 %v383_v40, 0.0  ;;  %v524_v45 = vmax.f32 %v500_v41, 0.0 }
 0x104   : > { %543 = vst.msk [vmem:[%s825_s6 + $0xe8] sm:$0xff] %vm527_vm2, %v409_v42  ;;  %669 = vst.msk [vmem:[%s825_s6 + $0xf8] sm:$0xff] %vm527_vm2, %v526_v43 }
 0x105   : > { %541 = vst.msk [vmem:[%s825_s6 + $0xc8] sm:$0xff] %vm527_vm2, %v407_v44  ;;  %667 = vst.msk [vmem:[%s825_s6 + $0xd8] sm:$0xff] %vm527_vm2, %v524_v45 }
 0x106 PF: > { %s14_s15 = sadd.s32 1, %s751_s15  }
 0x107   : > { %p11_p5 = scmp.ge.s32.totalorder %s14_s15, 6  }
 0x109   :  { %13 = sbr.rel (!%p11_p5) target bundleno = 1 (0x1), region = 67 }

</bundles_post_ra>
